<compile_context>
chip_gen: v5e
topology: v5e:2x2
jax: 0.10.0
libtpu: 0.0.40
codegen_flags: <defaults>
</compile_context>

<pallas_src>
import functools

import jax
import jax.numpy as jnp
from jax import lax
from jax.experimental import pallas as pl
from jax.experimental.pallas import tpu as pltpu


def _cdiv(a, b):
    return -(-a // b)


@functools.lru_cache(maxsize=None)
def _vmem_budgets():
    """(pipeline_vmem_budget, vmem_limit_bytes), generation-aware."""
    try:
        cap = int(pltpu.get_tpu_info().vmem_capacity_bytes)
    except Exception:
        cap = 64 * 1024 * 1024  # conservative (v7x-like) fallback
    if cap >= 128 * 1024 * 1024:           # v5e / v6e: 128 MiB physical VMEM
        return 96 * 1024 * 1024, 104 * 1024 * 1024
    return 36 * 1024 * 1024, 48 * 1024 * 1024   # v7x: 64 MiB physical VMEM


# --------------------------------------------------------------------------
# Kernel 1: fully fused single-pass CALayer (one read + one write of x).
# --------------------------------------------------------------------------
def _ca_fused_kernel(*refs, pre_relu, with_residual, inv_hw):
    if with_residual:
        x_ref, r_ref, w1t_ref, w2t_ref, o_ref = refs
    else:
        x_ref, w1t_ref, w2t_ref, o_ref = refs
        r_ref = None

    x = x_ref[...]                                         # (Bt, C, HW) native dtype
    if pre_relu:
        x = jnp.maximum(x, jnp.zeros((), x.dtype))

    # Global average pool over HW, accumulated in f32 (no full-block f32 copy).
    pooled = jnp.sum(x, axis=-1, dtype=jnp.float32) * inv_hw        # (Bt, C)

    # Squeeze/excite MLP as batched matmuls (weights pre-transposed).
    h = jnp.maximum(
        jnp.dot(pooled, w1t_ref[...].astype(jnp.float32),
                preferred_element_type=jnp.float32), 0.0)
    s = jax.nn.sigmoid(
        jnp.dot(h, w2t_ref[...].astype(jnp.float32),
                preferred_element_type=jnp.float32))                # (Bt, C)

    out = x * s.astype(x.dtype)[:, :, None]                # rescale in native dtype
    if with_residual:
        out = out + r_ref[...]
    o_ref[...] = out.astype(o_ref.dtype)


# --------------------------------------------------------------------------
# Kernel 2a (two-pass path): pool-accumulate over HW tiles + MLP finalize.
# --------------------------------------------------------------------------
def _ca_pool_kernel(x_ref, w1t_ref, w2t_ref, s_ref, acc_ref, *,
                    pre_relu, inv_hw, hw, hwt):
    hw_i = pl.program_id(1)

    @pl.when(hw_i == 0)
    def _():
        acc_ref[...] = jnp.zeros_like(acc_ref)

    x = x_ref[...]                                          # (Bt, C, hwt) native dtype
    if pre_relu:
        x = jnp.maximum(x, jnp.zeros((), x.dtype))
    if hw % hwt != 0:
        # Mask the (garbage) tail lanes of the last HW tile.
        lane = lax.broadcasted_iota(jnp.int32, x.shape, x.ndim - 1)
        valid = (hw_i * hwt + lane) < hw
        x = jnp.where(valid, x, jnp.zeros((), x.dtype))
    acc_ref[...] += jnp.sum(x, axis=-1, dtype=jnp.float32)  # (Bt, C) partial sums

    @pl.when(hw_i == pl.num_programs(1) - 1)
    def _():
        pooled = acc_ref[...] * inv_hw                      # (Bt, C)
        h = jnp.maximum(
            jnp.dot(pooled, w1t_ref[...].astype(jnp.float32),
                    preferred_element_type=jnp.float32), 0.0)
        s = jax.nn.sigmoid(
            jnp.dot(h, w2t_ref[...].astype(jnp.float32),
                    preferred_element_type=jnp.float32))
        s_ref[...] = s[:, :, None].astype(s_ref.dtype)      # (Bt, C, 1)


# --------------------------------------------------------------------------
# Kernel 2b (two-pass path): lane-dense channel rescale (+ fused elementwise).
# OOB lanes of the last HW tile / last batch block are discarded on store.
# --------------------------------------------------------------------------
def _ca_scale_kernel(*refs, pre_relu, with_residual):
    if with_residual:
        x_ref, r_ref, s_ref, o_ref = refs
    else:
        x_ref, s_ref, o_ref = refs
        r_ref = None

    x = x_ref[...]                                          # (Bt, C, hwt) native dtype
    if pre_relu:
        x = jnp.maximum(x, jnp.zeros((), x.dtype))
    out = x * s_ref[...].astype(x.dtype)                    # (Bt, C, 1) broadcast
    if with_residual:
        out = out + r_ref[...]
    o_ref[...] = out.astype(o_ref.dtype)


# --------------------------------------------------------------------------
# Wrapper
# --------------------------------------------------------------------------
@functools.partial(
    jax.jit,
    static_argnames=("pre_relu", "target_block_bytes", "pipeline_vmem_budget"))
def ca_layer(x, w1, w2, residual=None, *, pre_relu=False,
             target_block_bytes=4 * 1024 * 1024,
             pipeline_vmem_budget=None):
    """Channel-attention layer (CALayer) with optional fused pre-ReLU / residual.

    x        : (B, C, H, W)
    w1       : (C // reduction, C)   first Linear weight (out, in), no bias
    w2       : (C, C // reduction)   second Linear weight (out, in), no bias
    residual : optional (B, C, H, W), added after the channel rescale
    pre_relu : apply ReLU to x before the whole layer (Bottleneck pattern)

    out = [relu](x) * sigmoid(W2 @ relu(W1 @ mean_HW([relu](x)))) [+ residual]
    """
    B, C, H, W = x.shape
    HW = H * W
    Cr = w1.shape[0]
    dtype = x.dtype
    itemsize = jnp.dtype(dtype).itemsize

    budget_default, vmem_limit = _vmem_budgets()
    if pipeline_vmem_budget is None:
        pipeline_vmem_budget = budget_default

    # Keep HW on the lane axis; no padding (no extra HBM pad/slice passes).
    x3 = x.reshape(B, C, HW)
    with_residual = residual is not None
    r3 = residual.reshape(B, C, HW) if with_residual else None

    # Pre-transpose weights on the host; fed in their native dtype.
    w1t = w1.T       # (C, Cr)
    w2t = w2.T       # (Cr, C)
    inv_hw = 1.0 / float(HW)

    per_batch = C * HW * itemsize
    n_slabs = 2 + (1 if with_residual else 0)        # x in, out (+ residual)
    # Double-buffered slabs plus ~1 slab of slack for any f32 intermediate.
    vmem_per_bt = per_batch * (2 * n_slabs + 2)
    min_block_bytes = 512 * 1024
    target_steps = 8

    if vmem_per_bt <= pipeline_vmem_budget:
        # ---------------- single fused pass ----------------
        bt_vmem = max(1, pipeline_vmem_budget // max(1, vmem_per_bt))
        bt_block = max(1, target_block_bytes // max(1, per_batch))
        bt = min(B, bt_vmem, bt_block)
        # Aim for ~target_steps grid steps without shrinking blocks below
        # ~min_block_bytes ...
        bt_floor = max(1, _cdiv(min_block_bytes, max(1, per_batch)))
        bt = min(bt, max(max(1, B // target_steps), bt_floor))
        # ... but always keep >= 2 grid steps when B >= 2 (pipelining + both
        # v7x TensorCores).
        bt = min(bt, max(1, _cdiv(B, 2)))
        bt = max(1, min(bt, bt_vmem, B))
        grid = (_cdiv(B, bt),)

        in_specs = [pl.BlockSpec((bt, C, HW), lambda b: (b, 0, 0))]
        args = [x3]
        if with_residual:
            in_specs.append(pl.BlockSpec((bt, C, HW), lambda b: (b, 0, 0)))
            args.append(r3)
        in_specs += [pl.BlockSpec((C, Cr), lambda b: (0, 0)),
                     pl.BlockSpec((Cr, C), lambda b: (0, 0))]
        args += [w1t, w2t]

        out3 = pl.pallas_call(
            functools.partial(_ca_fused_kernel, pre_relu=pre_relu,
                              with_residual=with_residual, inv_hw=inv_hw),
            out_shape=jax.ShapeDtypeStruct((B, C, HW), dtype),
            grid_spec=pltpu.PrefetchScalarGridSpec(
                num_scalar_prefetch=0,
                grid=grid,
                in_specs=in_specs,
                out_specs=pl.BlockSpec((bt, C, HW), lambda b: (b, 0, 0))),
            compiler_params=pltpu.CompilerParams(
                dimension_semantics=("parallel",),
                vmem_limit_bytes=vmem_limit),
        )(*args)
    else:
        # -------- two passes: pool-accumulate over HW tiles, then rescale --------
        # HW tile: multiple of 128, cdiv-tiled (masked tail), ~target bytes.
        lane_chunk_bytes = C * 128 * itemsize
        hwt = 128 * max(1, min(_cdiv(HW, 128),
                               max(1, target_block_bytes // max(1, lane_chunk_bytes))))
        nhw = _cdiv(HW, hwt)

        # Raise bt above 1 only if blocks would otherwise be tiny.
        block_bytes = C * hwt * itemsize
        bt = 1
        if block_bytes < min_block_bytes:
            bt = min(B, max(1, min_block_bytes // max(1, block_bytes)))
            bt = min(bt, max(1, _cdiv(B, 2)))   # keep >= 2 batch steps when B >= 2
        nb = _cdiv(B, bt)

        # Pass 1: partial sums over "arbitrary" HW tiles, MLP at the last tile.
        s = pl.pallas_call(
            functools.partial(_ca_pool_kernel, pre_relu=pre_relu, inv_hw=inv_hw,
                              hw=HW, hwt=hwt),
            out_shape=jax.ShapeDtypeStruct((B, C, 1), jnp.float32),
            grid_spec=pltpu.PrefetchScalarGridSpec(
                num_scalar_prefetch=0,
                grid=(nb, nhw),
                in_specs=[pl.BlockSpec((bt, C, hwt), lambda b, h: (b, 0, h)),
                          pl.BlockSpec((C, Cr), lambda b, h: (0, 0)),
                          pl.BlockSpec((Cr, C), lambda b, h: (0, 0))],
                out_specs=pl.BlockSpec((bt, C, 1), lambda b, h: (b, 0, 0)),
                scratch_shapes=[pltpu.VMEM((bt, C), jnp.float32)]),
            compiler_params=pltpu.CompilerParams(
                dimension_semantics=("parallel", "arbitrary"),
                vmem_limit_bytes=vmem_limit),
        )(x3, w1t, w2t)

        # Pass 2: lane-dense rescale (+ fused pre-ReLU / residual add).
        in_specs = [pl.BlockSpec((bt, C, hwt), lambda b, h: (b, 0, h))]
        args = [x3]
        if with_residual:
            in_specs.append(pl.BlockSpec((bt, C, hwt), lambda b, h: (b, 0, h)))
            args.append(r3)
        in_specs.append(pl.BlockSpec((bt, C, 1), lambda b, h: (b, 0, 0)))
        args.append(s)

        out3 = pl.pallas_call(
            functools.partial(_ca_scale_kernel, pre_relu=pre_relu,
                              with_residual=with_residual),
            out_shape=jax.ShapeDtypeStruct((B, C, HW), dtype),
            grid_spec=pltpu.PrefetchScalarGridSpec(
                num_scalar_prefetch=0,
                grid=(nb, nhw),
                in_specs=in_specs,
                out_specs=pl.BlockSpec((bt, C, hwt), lambda b, h: (b, 0, h))),
            compiler_params=pltpu.CompilerParams(
                dimension_semantics=("parallel", "parallel"),
                vmem_limit_bytes=vmem_limit),
        )(*args)

    return out3.reshape(B, C, H, W)


# --------------------------------------------------------------------------
# Pure-JAX reference mirroring the PyTorch CALayer forward (+ fused variants).
# --------------------------------------------------------------------------
def _reference(x, w1, w2, residual=None, pre_relu=False):
    xe = jnp.maximum(x, 0.0) if pre_relu else x
    pooled = jnp.mean(xe, axis=(2, 3))                 # (B, C)
    h = jnp.maximum(pooled @ w1.T, 0.0)                # (B, Cr)
    s = jax.nn.sigmoid(h @ w2.T)                       # (B, C)
    out = xe * s[:, :, None, None]
    if residual is not None:
        out = out + residual
    return out


if __name__ == "__main__":
    key = jax.random.PRNGKey(0)
    kx, k1, k2, kr, ky = jax.random.split(key, 5)

    B, C = 2, 32
    reduction = 16
    Cr = C // reduction

    w1 = jax.random.normal(k1, (Cr, C), dtype=jnp.float32) * (1.0 / C) ** 0.5
    w2 = jax.random.normal(k2, (C, Cr), dtype=jnp.float32) * (1.0 / Cr) ** 0.5

    # ---- Test 1: single fused pass, 128-multiple HW ----
    H, W = 16, 16
    x = jax.random.normal(kx, (B, C, H, W), dtype=jnp.float32)
    out = jax.block_until_ready(ca_layer(x, w1, w2))
    ref = _reference(x, w1, w2)
    assert out.shape == (B, C, H, W)
    assert jnp.allclose(out, ref, atol=1e-5, rtol=1e-5), "fused path mismatch"

    # ---- Test 2: single fused pass, non-128-multiple HW (no host pad/slice),
    #      with fused pre-ReLU and residual add. ----
    H2, W2 = 15, 15
    x2 = jax.random.normal(ky, (B, C, H2, W2), dtype=jnp.float32)
    res = jax.random.normal(kr, (B, C, H2, W2), dtype=jnp.float32)
    out2 = jax.block_until_ready(ca_layer(x2, w1, w2, res, pre_relu=True))
    ref2 = _reference(x2, w1, w2, residual=res, pre_relu=True)
    assert out2.shape == (B, C, H2, W2)
    assert jnp.allclose(out2, ref2, atol=1e-5, rtol=1e-5), "fused (ragged) mismatch"

    # ---- Test 3: two-pass (pool-accumulate + rescale) path, forced with tiny
    #      budgets, exercising the masked tail HW tile. ----
    out3 = jax.block_until_ready(
        ca_layer(x2, w1, w2, res, pre_relu=True,
                 target_block_bytes=16 * 1024,
                 pipeline_vmem_budget=64 * 1024))
    assert out3.shape == (B, C, H2, W2)
    assert jnp.allclose(out3, ref2, atol=1e-5, rtol=1e-5), "two-pass mismatch"

    print("KERNEL_OK")
</pallas_src>

<mosaic_0001>
module attributes {stable_mosaic.version = 11 : i64} {
  func.func @_ca_fused_kernel(%arg0: i32, %arg1: memref<1x32x256xf32, #tpu.memory_space<vmem>>, %arg2: memref<32x2xf32, #tpu.memory_space<vmem>>, %arg3: memref<2x32xf32, #tpu.memory_space<vmem>>, %arg4: memref<1x32x256xf32, #tpu.memory_space<vmem>>) attributes {dimension_semantics = [#tpu.dimension_semantics<parallel>], iteration_bounds = array<i64: 2>, scalar_prefetch = 0 : i64, scratch_operands = 0 : i64, tpu.core_type = #tpu.core_type<tc>, window_params = [{transform_indices = @transform_0, window_bounds = array<i64: 1, 32, 256>}, {pipeline_mode = #tpu.pipeline_mode<synchronous>, transform_indices = @transform_1, window_bounds = array<i64: 32, 2>}, {pipeline_mode = #tpu.pipeline_mode<synchronous>, transform_indices = @transform_2, window_bounds = array<i64: 2, 32>}, {transform_indices = @transform_3, window_bounds = array<i64: 1, 32, 256>}]} {
    %c0 = arith.constant 0 : index
    %c0_0 = arith.constant 0 : index
    %c0_1 = arith.constant 0 : index
    %0 = vector.load %arg1[%c0, %c0_0, %c0_1] : memref<1x32x256xf32, #tpu.memory_space<vmem>>, vector<1x32x256xf32>
    %cst = arith.constant dense<0.000000e+00> : vector<1x32xf32>
    %1 = vector.multi_reduction <add>, %0, %cst [2] : vector<1x32x256xf32> to vector<1x32xf32>
    %cst_2 = arith.constant 3.906250e-03 : f32
    %2 = vector.broadcast %cst_2 : f32 to vector<1x32xf32>
    %3 = arith.mulf %1, %2 : vector<1x32xf32>
    %c0_3 = arith.constant 0 : index
    %c0_4 = arith.constant 0 : index
    %4 = vector.load %arg2[%c0_3, %c0_4] : memref<32x2xf32, #tpu.memory_space<vmem>>, vector<32x2xf32>
    %cst_5 = arith.constant dense<0.000000e+00> : vector<1x2xf32>
    %5 = tpu.matmul %3, %4, %cst_5 {dimension_numbers = #tpu.dot_dimension_numbers<[1], [0], [0], [1], [0, 0, 1, 1], [], []>} : vector<1x32xf32>, vector<32x2xf32>, vector<1x2xf32> -> vector<1x2xf32>
    %cst_6 = arith.constant 0.000000e+00 : f32
    %6 = vector.broadcast %cst_6 : f32 to vector<1x2xf32>
    %7 = arith.maximumf %5, %6 : vector<1x2xf32>
    %c0_7 = arith.constant 0 : index
    %c0_8 = arith.constant 0 : index
    %8 = vector.load %arg3[%c0_7, %c0_8] : memref<2x32xf32, #tpu.memory_space<vmem>>, vector<2x32xf32>
    %cst_9 = arith.constant dense<0.000000e+00> : vector<1x32xf32>
    %9 = tpu.matmul %7, %8, %cst_9 {dimension_numbers = #tpu.dot_dimension_numbers<[1], [0], [0], [1], [0, 0, 1, 1], [], []>} : vector<1x2xf32>, vector<2x32xf32>, vector<1x32xf32> -> vector<1x32xf32>
    %10 = arith.negf %9 : vector<1x32xf32>
    %11 = math.exp %10 : vector<1x32xf32>
    %cst_10 = arith.constant 1.000000e+00 : f32
    %12 = vector.broadcast %cst_10 : f32 to vector<1x32xf32>
    %13 = arith.addf %12, %11 : vector<1x32xf32>
    %14 = arith.divf %12, %13 : vector<1x32xf32>
    %15 = vector.shape_cast %14 : vector<1x32xf32> to vector<1x32x1xf32>
    %16 = vector.broadcast %15 : vector<1x32x1xf32> to vector<1x32x256xf32>
    %17 = arith.mulf %0, %16 : vector<1x32x256xf32>
    %c0_11 = arith.constant 0 : index
    %c0_12 = arith.constant 0 : index
    %c0_13 = arith.constant 0 : index
    %18 = vector.load %arg4[%c0_11, %c0_12, %c0_13] : memref<1x32x256xf32, #tpu.memory_space<vmem>>, vector<1x32x256xf32>
    tpu.vector_store %arg4[%c0_11, %c0_12, %c0_13], %17 {strides = array<i32>} : memref<1x32x256xf32, #tpu.memory_space<vmem>>, vector<1x32x256xf32>,
    return
  }
  func.func @transform_0(%arg0: i32) -> (i32, i32, i32) {
    %c0_i32 = arith.constant 0 : i32
    %c0_i32_0 = arith.constant 0 : i32
    %c0_i32_1 = arith.constant 0 : i32
    return %arg0, %c0_i32, %c0_i32_0 : i32, i32, i32
  }
  func.func @transform_1(%arg0: i32) -> (i32, i32) {
    %c0_i32 = arith.constant 0 : i32
    %c0_i32_0 = arith.constant 0 : i32
    %c0_i32_1 = arith.constant 0 : i32
    return %c0_i32, %c0_i32_0 : i32, i32
  }
  func.func @transform_2(%arg0: i32) -> (i32, i32) {
    %c0_i32 = arith.constant 0 : i32
    %c0_i32_0 = arith.constant 0 : i32
    %c0_i32_1 = arith.constant 0 : i32
    return %c0_i32, %c0_i32_0 : i32, i32
  }
  func.func @transform_3(%arg0: i32) -> (i32, i32, i32) {
    %c0_i32 = arith.constant 0 : i32
    %c0_i32_0 = arith.constant 0 : i32
    %c0_i32_1 = arith.constant 0 : i32
    return %arg0, %c0_i32, %c0_i32_0 : i32, i32, i32
  }
}

</mosaic_0001>

<bundles_post_ra>
// kernel: ca_layer.1
= control target key start
LH: loop header
LB: loop body
LE: loop exit
PB: predicated region body
PF: predicated region fallthrough
CT: control target
= control target key end

     0   :  { %s448_s12 = smov 0   ;;  %s519_s0 = inlined_call_operand.vmem [shape: f32[2,32,256], index: 0, kind: input, shape index: {}]   ;;  %s520_s1 = inlined_call_operand.vmem [shape: f32[32,2], index: 1, kind: input, shape index: {}]   ;;  %s521_s2 = inlined_call_operand.vmem [shape: f32[2,32], index: 2, kind: input, shape index: {}]   ;;  %s522_s3 = inlined_call_operand.vmem [shape: f32[2,32,256], index: 3, kind: output, shape index: {}]  }
   0x1 LB: > { %s386_s13 = sadd.s32 4294967295, %s426_s12   ;;  %p390_p0 = scmp.ge.s32.totalorder %s426_s12, 1  ;;  %s426_s12 = sphi %s448_s12, %s13_s12  }
   0x2   : > { %p137_p1 = scmp.lt.s32.totalorder %s426_s12, 3 }
   0x4   : > { %p138_p2 = pnand %p390_p0, %p137_p1 }
   0x5   : > { %p161_p3 = scmp.lt.s32.totalorder (!%p138_p2), %s386_s13, 1 }
   0x6   : > { %141 = sbr.rel (%p138_p2) target bundleno = 553 (0x229), region = 32 }
   0xb   : > { %s524_s13 = smov (!%p161_p3, %s386_s13), 1  ;;  %v198_v12 = vld [vmem:[%s520_s1 + $0x18] sm:$0xff]  ;;  %v197_v13 = vld [vmem:[%s520_s1 + $0x10] sm:$0xff]  ;;  %v196_v14 = vld [vmem:[%s520_s1 + $0x8] sm:$0xff]  ;;  %v203_v16 = vlaneseq  ;;  %vm208_vm0 = vcmask 130112   ;;  %vm212_vm1 = vcmask 195712  }
   0xc   : > { %s401_s14 = sshll.u32 %s524_s13, 6  ;;  %233 = vmatpush.msra.mxu0 %v198_v12  ;;  %v195_v15 = vld [vmem:[%s520_s1] sm:$0xff]  ;;  %vm216_vm2 = vcmask 261312   ;;  %vm218_vm3 = vcmask 261120   ;;  %vm247_vm4 = vcmask 1041408   ;;  %vm243_vm5 = vcmask 15360  }
   0xd   : > { %s165_s17 = scalar_lea.vmem %s519_s0, %s401_s14  ;;  %v204_v19 = vand.u32 127, %v203_v16  ;;  %v242_v36 = vld [vmem:[%s521_s2] sm:$0x3]  ;;  %v292_v39 = vshrl.u32 %v203_v16, 7  ;;  %s170_s30 = scalar_lea.vmem %s522_s3, %s401_s14 }
   0xe   : > { %v464_v0 = vld [vmem:[%s165_s17] sm:$0xff]  ;;  %v466_v1 = vld [vmem:[%s165_s17 + $0x8] sm:$0xff]  ;;  %v476_v6 = vld [vmem:[%s165_s17 + $0x10] sm:$0xff]  ;;  %234 = vmatpush.msra.mxu0 %v197_v13  ;;  %396 = vmatpush.msk.msra.mxu1 %vm247_vm4, %v242_v36 }
   0xf   : > { %v468_v2 = vld [vmem:[%s165_s17 + $0x20] sm:$0xff]  ;;  %v179_v3 = vadd.f32 %v466_v1, %v464_v0  ;;  %v472_v4 = vld [vmem:[%s165_s17 + $0x28] sm:$0xff]  ;;  %v478_v7 = vld [vmem:[%s165_s17 + $0x18] sm:$0xff]  ;;  %v206_v21 = vadd.s32 4294967288, %v204_v19  ;;  %v210_v22 = vadd.s32 4294967280, %v204_v19  ;;  %v214_v25 = vadd.s32 4294967272, %v204_v19  ;;  %411 = vset.pattern.permute.xlu2 %v292_v39 }
  0x10   : > { %v185_v5 = vadd.f32 %v472_v4, %v468_v2  ;;  %v480_v8 = vld [vmem:[%s165_s17 + $0x30] sm:$0xff]  ;;  %v482_v9 = vld [vmem:[%s165_s17 + $0x38] sm:$0xff]  ;;  %v182_v10 = vadd.f32 %v478_v7, %v476_v6  ;;  %235 = vmatpush.msra.mxu0 %v196_v14  ;;  %v311_v40 = vadd.s32 24, %v292_v39  ;;  %v305_v41 = vadd.s32 16, %v292_v39 }
  0x11   : > { %180 = vadd.xlane.f32.xlu0 %v179_v3  ;;  %v188_v11 = vadd.f32 %v482_v9, %v480_v8  ;;  %v299_v57 = vadd.s32 8, %v292_v39 }
  0x12   : > { %186 = vadd.xlane.f32.xlu1 %v185_v5  ;;  %236 = vmatpush.msra.mxu0 %v195_v15 }
  0x13   : > { %414 = vset.pattern.permute.xlu1 %v311_v40  ;;  %413 = vset.pattern.permute.xlu0 %v305_v41 }
  0x19   : > { %183 = vadd.xlane.f32.xlu0 %v182_v10 }
  0x1a   : > { %189 = vadd.xlane.f32.xlu1 %v188_v11 }
  0x84   : > { %v181_v17 = vpop.xlane.xlu0 %180 }
  0x85   : > { %v187_v18 = vpop.xlane.xlu1 %186  ;;  %v191_v20 = vmul.f32 0.00390625, %v181_v17 }
  0x86   : > { %v193_v23 = vmul.f32 0.00390625, %v187_v18 }
  0x87   : > { %v205_v29 = vperm.slane %v191_v20, %v204_v19 }
  0x88   : > { %v211_v31 = vperm.slane %v193_v23, %v210_v22 }
  0x8c   : > { %v184_v24 = vpop.xlane.xlu0 %183 }
  0x8d   : > { %v192_v26 = vmul.f32 0.00390625, %v184_v24  ;;  %v190_v27 = vpop.xlane.xlu1 %189 }
  0x8e   : > { %v194_v28 = vmul.f32 0.00390625, %v190_v27 }
  0x8f   : > { %v207_v30 = vperm.slane %v192_v26, %v206_v21 }
  0x90   : > { %v215_v32 = vperm.slane %v194_v28, %v214_v25 }
  0x91   : > { %v209_v33 = vsel %vm208_vm0, %v207_v30, %v205_v29 }
  0x92   : > { %v213_v34 = vsel %vm212_vm1, %v211_v31, %v209_v33 }
  0x93   : > { %v217_v35 = vsel %vm216_vm2, %v215_v32, %v213_v34 }
  0x94   : > { %395 = vmatmul.msk.f32.vlgmr.msra.gmra.mxu0 %vm218_vm3, %v217_v35 }
 0x111   : > { %v238_v37 = vpop.f32.mrf.mxu0 }
 0x112   : > { %v241_v38 = vmax.f32 %v238_v37, 0.0 }
 0x114   : > { %397 = vmatmul.msk.f32.vlgmr.msra.gmra.mxu1 %vm243_vm5, %v241_v38 }
 0x191   : > { %v268_v42 = vpop.f32.mrf.mxu1 }
 0x192   : > { %v398_v43 = vmul.f32 -1.442695, %v268_v42 }
 0x194   : > { %416 = vpow2.f32 %v398_v43 }
 0x19a   : > { %v417_v44 = vpop.eup %416 }
 0x19b   : > { %v274_v45 = vadd.f32 1.0, %v417_v44 }
 0x19d   : > { %418 = vrcp.f32 %v274_v45  ;;  %v286_v49 = vand.u32 2147483648, %v274_v45  ;;  %v284_v51 = vand.u32 2147483647, %v274_v45  ;;  %vm280_vm7 = vweird.f32 %v274_v45 }
 0x19f   : > { %v287_v53 = vor.u32 1.1754944e-38, %v286_v49  ;;  %vm285_vm9 = vcmp.eq.f32.partialorder %v284_v51, 8.507059e+37 }
 0x1a3   : > { %v419_v46 = vpop.eup %418 }
 0x1a4   : > { %v276_v47 = vmul.f32 %v419_v46, %v274_v45  ;;  %vm281_vm6 = vweird.f32 %v419_v46 }
 0x1a5   : > { %vm282_vm8 = vmor %vm280_vm7, %vm281_vm6 }
 0x1a6   : > { %v277_v48 = vsub.f32 1.0, %v276_v47 }
 0x1a8   : > { %v278_v50 = vmul.f32 %v419_v46, %v277_v48 }
 0x1aa   : > { %v279_v52 = vadd.f32 %v419_v46, %v278_v50 }
 0x1ac   : > { %v283_v54 = vsel %vm282_vm8, %v419_v46, %v279_v52 }
 0x1ad   : > { %v288_v55 = vsel %vm285_vm9, %v287_v53, %v283_v54 }
 0x1ae   : > { %v290_v56 = vperm.slane %v288_v55, 0 }
 0x1b0   : > { %313 = vperm.xlu1 %414, %v290_v56   ;;  %307 = vperm.xlu0 %413, %v290_v56  }
 0x1b1   : > { %295 = vperm.xlu2 %411, %v290_v56  }
 0x1b8   : > { %415 = vset.pattern.permute.xlu0 %v311_v40 }
 0x1b9   : > { %412 = vset.pattern.permute.xlu2 %v299_v57 }
 0x1c1   : > { %301 = vperm.xlu2 %412, %v290_v56  }
 0x20b   : > { %v296_v58 = vpop.permute.xlu2 %295 }
 0x20c   : > { %v315_v59 = vmul.f32 %v296_v58, %v464_v0  ;;  %v316_v60 = vmul.f32 %v296_v58, %v466_v1 }
 0x20e   : > { %323 = vst [vmem:[%s170_s30] sm:$0xff] %v315_v59 }
 0x20f   : > { %324 = vst [vmem:[%s170_s30 + $0x8] sm:$0xff] %v316_v60 }
 0x21b   : > { %v302_v61 = vpop.permute.xlu2 %301 }
 0x21c   : > { %v317_v62 = vmul.f32 %v302_v61, %v476_v6  ;;  %v318_v63 = vmul.f32 %v302_v61, %v478_v7 }
 0x21e   : > { %325 = vst [vmem:[%s170_s30 + $0x10] sm:$0xff] %v317_v62 }
 0x21f   : > { %326 = vst [vmem:[%s170_s30 + $0x18] sm:$0xff] %v318_v63 }
 0x222   : > { %v314_v3 = vpop.permute.xlu1 %313  ;;  %v308_v5 = vpop.permute.xlu0 %307 }
 0x223   : > { %v321_v10 = vmul.f32 %v314_v3, %v480_v8  ;;  %v322_v11 = vmul.f32 %v314_v3, %v482_v9  ;;  %v319_v12 = vmul.f32 %v308_v5, %v468_v2  ;;  %v320_v0 = vmul.f32 %v308_v5, %v472_v4 }
 0x225   : > { %329 = vst [vmem:[%s170_s30 + $0x30] sm:$0xff] %v321_v10 }
 0x226   : > { %330 = vst [vmem:[%s170_s30 + $0x38] sm:$0xff] %v322_v11 }
 0x227   : > { %327 = vst [vmem:[%s170_s30 + $0x20] sm:$0xff] %v319_v12 }
 0x228   : > { %328 = vst [vmem:[%s170_s30 + $0x28] sm:$0xff] %v320_v0 }
 0x229 PF: > { %s13_s12 = sadd.s32 1, %s426_s12  }
 0x22a   : > { %p10_p4 = scmp.ge.s32.totalorder %s13_s12, 4  }
 0x22c   :  { %12 = sbr.rel (!%p10_p4) target bundleno = 1 (0x1), region = 62 }

</bundles_post_ra>
